<compile_context>
chip_gen: v7x
topology: tpu7x:2x2x1
jax: 0.10.0
libtpu: 0.0.40
codegen_flags: <defaults>
</compile_context>

<pallas_src>
import functools

import jax
import jax.numpy as jnp
from jax.experimental import pallas as pl
from jax.experimental.pallas import tpu as pltpu


HIGHEST = jax.lax.Precision.HIGHEST   # true-f32 matmuls for host precompute / reference


def _up(n, m):
    return ((n + m - 1) // m) * m


# ------------------------------ static layout --------------------------------
def make_layout(eid_size, emb_dim, nearby_size, hidden_dim, rate_size):
    ES, E, NB, H, RS = eid_size, emb_dim, nearby_size, hidden_dim, rate_size

    # packed output row: [h_new (H) | log_probs (NB) | rate... (tail)] = ow lanes
    ow = _up(H + NB + RS, 128)
    ow_tail = ow - H - NB                     # >= RS by construction

    nrp = _up(NB + RS, 8)                     # padded [nearby|rate] contraction dim

    # weight-slab rows (each block start 8-aligned); 128-lane wide slab
    r = 0
    r_tih = r;  r += _up(ES, 8)               # tbl_ih  = embedding @ W_ih[:E]   (ES, 3H)
    r_inr = r;  r += nrp                      # W_ih[E:] zero-padded             (nrp, 3H)
    r_hh = r;   r += _up(H, 8)                # W_hh                             (H, 3H)
    r_head = r; r += _up(H, 8)                # [W_pre_eid | W_pre_rate_1(h)]    (H, NB+H)
    r_tpr1 = r; r += _up(ES, 8)               # tbl_pr1 = embedding @ W_pr1e     (ES, H)
    r_pr2 = r;  r += _up(H, 8)                # W_pre_rate_2 zero-padded         (H, ow_tail)
    r_bias = r; r += 8                        # 4 bias rows
    rw = _up(r, 8)
    lw = _up(max(3 * H, NB + H, H, ow_tail), 128)

    aw = _up(1 + NB + RS, 128)                # activation row: [eid | nearby | rate | 0..]

    return dict(ES=ES, E=E, NB=NB, H=H, RS=RS, nrp=nrp,
                r_tih=r_tih, r_inr=r_inr, r_hh=r_hh, r_head=r_head,
                r_tpr1=r_tpr1, r_pr2=r_pr2, r_bias=r_bias,
                rw=rw, lw=lw, aw=aw, ow=ow, ow_tail=ow_tail)


# --------------------------- weight-slab packing ------------------------------
def pack_weights(raw, L):
    """Pack all parameters (incl. table-premultiplied lookups) into one slab."""
    ES, E, NB, H, RS = L["ES"], L["E"], L["NB"], L["H"], L["RS"]
    f32 = jnp.float32
    emb = raw["embedding"].astype(f32)

    slab = jnp.zeros((L["rw"], L["lw"]), f32)
    # eid-embedding contribution to the GRU input gates, pre-multiplied.
    tbl_ih = jnp.dot(emb, raw["w_ih_t"][:E, :], precision=HIGHEST)           # (ES, 3H)
    slab = slab.at[L["r_tih"]:L["r_tih"] + ES, :3 * H].set(tbl_ih)
    slab = slab.at[L["r_inr"]:L["r_inr"] + NB + RS, :3 * H].set(raw["w_ih_t"][E:, :])
    slab = slab.at[L["r_hh"]:L["r_hh"] + H, :3 * H].set(raw["w_hh_t"])
    # fused head: [pre_eid | hidden half of pre_rate_1]
    w_head = jnp.concatenate([raw["w_pe_t"], raw["w_pr1h_t"]], axis=1)       # (H, NB+H)
    slab = slab.at[L["r_head"]:L["r_head"] + H, :NB + H].set(w_head)
    # selected-candidate-embedding contribution to pre_rate_1, pre-multiplied
    # (dropout is identity in eval mode).
    tbl_pr1 = jnp.dot(emb, raw["w_pr1e_t"], precision=HIGHEST)               # (ES, H)
    slab = slab.at[L["r_tpr1"]:L["r_tpr1"] + ES, :H].set(tbl_pr1)
    slab = slab.at[L["r_pr2"]:L["r_pr2"] + H, :RS].set(raw["w_pr2_t"])
    rb = L["r_bias"]
    slab = slab.at[rb + 0, :3 * H].set(raw["b_ih"][0])
    slab = slab.at[rb + 1, :3 * H].set(raw["b_hh"][0])
    slab = slab.at[rb + 2, :NB + H].set(
        jnp.concatenate([raw["b_pe"][0], raw["b_pr1"][0]]))
    slab = slab.at[rb + 3, :RS].set(raw["b_pr2"][0])
    return slab


# ------------------------------ Pallas kernel ---------------------------------
def make_kernel(L):
    ES, NB, H, nrp = L["ES"], L["NB"], L["H"], L["nrp"]
    r_tih, r_inr, r_hh = L["r_tih"], L["r_inr"], L["r_hh"]
    r_head, r_tpr1, r_pr2, r_bias = L["r_head"], L["r_tpr1"], L["r_pr2"], L["r_bias"]
    ow_tail = L["ow_tail"]

    def kernel(w_ref, act_ref, h0_ref, out_ref, h_scr):
        f32 = jnp.float32
        B = act_ref.shape[0]

        # hidden-state carry lives in VMEM scratch across grid (decode) steps
        @pl.when(pl.program_id(0) == 0)
        def _():
            h_scr[...] = h0_ref[...]

        a = act_ref[...]                              # (B, aw): [eid|nearby|rate|0..]
        eid_i = a[:, 0:1].astype(jnp.int32)           # (B, 1)
        nb_vals = a[:, 1:1 + NB]                      # (B, NB) candidate eids (float)
        nr = a[:, 1:1 + nrp]                          # (B, nrp) [nearby|rate|0..]
        h = h_scr[...]                                # (B, H)

        row = jax.lax.broadcasted_iota(jnp.int32, (B, ES), 1)
        oh_eid = (row == eid_i).astype(f32)           # one-hot over table rows

        # ---- GRU cell (PyTorch gate order r, z, n), single step ----
        tbl_ih = w_ref[r_tih:r_tih + ES, :3 * H]
        w_inr = w_ref[r_inr:r_inr + nrp, :3 * H]
        w_hh = w_ref[r_hh:r_hh + H, :3 * H]
        b_ih = w_ref[r_bias:r_bias + 1, :3 * H]
        b_hh = w_ref[r_bias + 1:r_bias + 2, :3 * H]
        gi = (jnp.dot(oh_eid, tbl_ih, preferred_element_type=f32)
              + jnp.dot(nr, w_inr, preferred_element_type=f32) + b_ih)
        gh = jnp.dot(h, w_hh, preferred_element_type=f32) + b_hh
        r = jax.nn.sigmoid(gi[:, :H] + gh[:, :H])
        z = jax.nn.sigmoid(gi[:, H:2 * H] + gh[:, H:2 * H])
        n = jnp.tanh(gi[:, 2 * H:] + r * gh[:, 2 * H:])
        h_new = (1.0 - z) * n + z * h
        h_scr[...] = h_new

        # ---- fused heads on h_new: [pre_eid logits | pre_rate_1 hidden half] ----
        w_head = w_ref[r_head:r_head + H, :NB + H]
        b_head = w_ref[r_bias + 2:r_bias + 3, :NB + H]
        head = jnp.dot(h_new, w_head, preferred_element_type=f32) + b_head
        logits = head[:, :NB]
        pr1_h = head[:, NB:NB + H]                    # h_new @ W_pr1h + b_pr1

        # ---- log_softmax over nearby candidates ----
        m = jnp.max(logits, axis=1, keepdims=True)
        shifted = logits - m
        lse = jnp.log(jnp.sum(jnp.exp(shifted), axis=1, keepdims=True))
        log_probs = shifted - lse

        # ---- first-max argmax; pick that candidate's eid value from `nearby` ----
        col = jax.lax.broadcasted_iota(jnp.int32, (B, NB), 1)
        amax = jnp.min(jnp.where(shifted >= 0.0, col, NB), axis=1, keepdims=True)
        sel_i = jnp.sum(jnp.where(col == amax, nb_vals, 0.0),
                        axis=1, keepdims=True).astype(jnp.int32)   # (B, 1)

        # ---- pre_rate head: onehot(sel) @ (embedding @ W_pr1e) + pr1_h ----
        # TODO(synk): training-mode dropout on the selected embedding is not
        # implemented (eval-mode identity is assumed).
        oh_sel = (row == sel_i).astype(f32)                        # (B, ES)
        tbl_pr1 = w_ref[r_tpr1:r_tpr1 + ES, :H]
        pr1 = jnp.dot(oh_sel, tbl_pr1, preferred_element_type=f32) + pr1_h
        w_pr2 = w_ref[r_pr2:r_pr2 + H, :ow_tail]
        b_pr2 = w_ref[r_bias + 3:r_bias + 4, :ow_tail]
        rate_wide = jax.nn.sigmoid(
            jnp.dot(jnp.maximum(pr1, 0.0), w_pr2, preferred_element_type=f32) + b_pr2)

        # ---- single lane-dense packed store: [h_new | log_probs | rate_wide] ----
        out_ref[...] = jnp.concatenate([h_new, log_probs, rate_wide], axis=1)

    return kernel


# --------------------------------- wrapper -------------------------------------
def make_forward(L):
    NB, H, RS = L["NB"], L["H"], L["RS"]
    kernel = make_kernel(L)

    @jax.jit
    def forward(w_slab, eids, nearbys, rates, hidden):
        """Runs T teacher-forced decode steps in ONE pallas_call.

        eids:(T,B) int32, nearbys:(T,B,NB) float32 (candidate eid values),
        rates:(T,B) float32, hidden:(1,B,H) float32.
        Returns (pre_eid_1:(T,B,NB), pre_rate_3:(T,B), hidden:(1,B,H)).
        T=1 is exactly the PyTorch module's forward.
        """
        T, B = eids.shape
        f32 = jnp.float32

        act = jnp.concatenate([
            eids.reshape(T * B, 1).astype(f32),
            nearbys.reshape(T * B, NB).astype(f32),
            rates.reshape(T * B, RS).astype(f32),
            jnp.zeros((T * B, L["aw"] - (1 + NB + RS)), f32),
        ], axis=1)                                             # (T*B, aw)
        h0 = hidden[0].astype(f32)                             # (B, H)

        out = pl.pallas_call(
            kernel,
            out_shape=jax.ShapeDtypeStruct((T * B, L["ow"]), f32),
            grid=(T,),
            in_specs=[
                # weight slab: same block every step -> DMA'd once, stays resident
                pl.BlockSpec((L["rw"], L["lw"]), lambda t: (0, 0)),
                # per-step activations stream through the pipeline
                pl.BlockSpec((B, L["aw"]), lambda t: (t, 0)),
                # initial hidden state, consumed only at step 0
                pl.BlockSpec((B, H), lambda t: (0, 0)),
            ],
            out_specs=pl.BlockSpec((B, L["ow"]), lambda t: (t, 0)),
            scratch_shapes=[pltpu.VMEM((B, H), f32)],          # hidden carry
            compiler_params=pltpu.CompilerParams(
                dimension_semantics=("arbitrary",)),           # sequential carry axis
        )(w_slab, act, h0)

        pre_eid_1 = out[:, H:H + NB].reshape(T, B, NB)
        pre_rate = out[:, H + NB:H + NB + RS].reshape(T, B, RS)
        pre_rate_3 = pre_rate[..., 0] if RS == 1 else pre_rate
        h_final = out[(T - 1) * B:, :H][None]                  # (1, B, H)
        return pre_eid_1, pre_rate_3, h_final

    return forward


# ---------------------------- parameter creation --------------------------------
def init_params(key, eid_size, rate_size, nearby_size, emb_dim, hidden_dim):
    in_dim = emb_dim + nearby_size + rate_size
    ks = jax.random.split(key, 12)

    def u(k, shape, scale=0.1):
        return jax.random.uniform(k, shape, jnp.float32, -scale, scale)

    return {
        "embedding": u(ks[0], (eid_size, emb_dim), 1.0),
        # GRU (gate order r,z,n), stored transposed: (in, 3H) / (H, 3H)
        "w_ih_t": u(ks[1], (in_dim, 3 * hidden_dim)),
        "w_hh_t": u(ks[2], (hidden_dim, 3 * hidden_dim)),
        "b_ih": u(ks[3], (1, 3 * hidden_dim)),
        "b_hh": u(ks[4], (1, 3 * hidden_dim)),
        # pre_eid: Linear(H -> NB)
        "w_pe_t": u(ks[5], (hidden_dim, nearby_size)),
        "b_pe": u(ks[6], (1, nearby_size)),
        # pre_rate_1: Linear(E+H -> H), split into emb part and hidden part
        "w_pr1e_t": u(ks[7], (emb_dim, hidden_dim)),
        "w_pr1h_t": u(ks[8], (hidden_dim, hidden_dim)),
        "b_pr1": u(ks[9], (1, hidden_dim)),
        # pre_rate_2: Linear(H -> rate_size)
        "w_pr2_t": u(ks[10], (hidden_dim, rate_size)),
        "b_pr2": u(ks[11], (1, rate_size)),
    }


# ------------------------ pure-JAX reference (for check) ------------------------
def reference_step(params, eid, nearby, rate, hidden):
    """Pure-JAX port of DecoderConstrain.forward (eval mode), true-f32 matmuls."""
    H = params["w_hh_t"].shape[0]
    dot = functools.partial(jnp.dot, precision=HIGHEST)
    emb_eid = jnp.take(params["embedding"], eid, axis=0)
    x = jnp.concatenate([emb_eid, nearby, rate.reshape(-1, 1)], axis=1)
    h = hidden[0]
    gi = dot(x, params["w_ih_t"]) + params["b_ih"]
    gh = dot(h, params["w_hh_t"]) + params["b_hh"]
    r = jax.nn.sigmoid(gi[:, :H] + gh[:, :H])
    z = jax.nn.sigmoid(gi[:, H:2 * H] + gh[:, H:2 * H])
    n = jnp.tanh(gi[:, 2 * H:] + r * gh[:, 2 * H:])
    h_new = (1 - z) * n + z * h
    logits = dot(h_new, params["w_pe_t"]) + params["b_pe"]
    log_probs = jax.nn.log_softmax(logits, axis=1)
    sel = jnp.take_along_axis(nearby, jnp.argmax(log_probs, axis=1)[:, None], axis=1)[:, 0]
    emb_sel = jnp.take(params["embedding"], sel.astype(jnp.int32), axis=0)
    pr1 = dot(jnp.concatenate([emb_sel, h_new], axis=1),
              jnp.concatenate([params["w_pr1e_t"], params["w_pr1h_t"]], axis=0)
              ) + params["b_pr1"]
    pr2 = dot(jnp.maximum(pr1, 0.0), params["w_pr2_t"]) + params["b_pr2"]
    return log_probs, jax.nn.sigmoid(pr2)[:, 0], h_new[None]


# ------------------------------------ main --------------------------------------
if __name__ == "__main__":
    cfg = dict(eid_size=32, rate_size=1, nearby_size=8,
               embedding_size=16, hidden_size=32, dropout_rate=0.1)
    B, T = 8, 4

    key = jax.random.PRNGKey(0)
    kp, k1, k2, k3, k4 = jax.random.split(key, 5)
    raw = init_params(kp, cfg["eid_size"], cfg["rate_size"], cfg["nearby_size"],
                      cfg["embedding_size"], cfg["hidden_size"])

    L = make_layout(cfg["eid_size"], cfg["embedding_size"], cfg["nearby_size"],
                    cfg["hidden_size"], cfg["rate_size"])
    w_slab = pack_weights(raw, L)          # built once; resident for a whole launch
    forward = make_forward(L)

    eids = jax.random.randint(k1, (T, B), 0, cfg["eid_size"], dtype=jnp.int32)
    # `nearby` holds candidate eid values (stored as float, as the torch code cats it)
    nearbys = jax.random.randint(
        k2, (T, B, cfg["nearby_size"]), 0, cfg["eid_size"]).astype(jnp.float32)
    rates = jax.random.uniform(k3, (T, B), jnp.float32)
    hidden0 = jax.random.normal(k4, (1, B, cfg["hidden_size"]), jnp.float32)

    # ---- multi-step decode: T module-forward steps in ONE pallas_call ----
    pe, pr, h_fin = jax.block_until_ready(
        forward(w_slab, eids, nearbys, rates, hidden0))

    # ---- reference: apply the module's forward T times sequentially ----
    h = hidden0
    ref_pe, ref_pr = [], []
    for t in range(T):
        lp, rt, h = reference_step(raw, eids[t], nearbys[t], rates[t], h)
        ref_pe.append(lp)
        ref_pr.append(rt)
    ref_pe = jnp.stack(ref_pe)
    ref_pr = jnp.stack(ref_pr)

    assert pe.shape == (T, B, cfg["nearby_size"])
    assert pr.shape == (T, B)
    assert h_fin.shape == (1, B, cfg["hidden_size"])
    assert jnp.allclose(pe, ref_pe, atol=1e-4, rtol=1e-4), "log-softmax mismatch"
    assert jnp.allclose(pr, ref_pr, atol=1e-4, rtol=1e-4), "rate mismatch"
    assert jnp.allclose(h_fin, h, atol=1e-4, rtol=1e-4), "hidden mismatch"

    # ---- single-step call (T=1): exactly the module's forward semantics ----
    pe1, prr1, h1 = jax.block_until_ready(
        forward(w_slab, eids[:1], nearbys[:1], rates[:1], hidden0))
    lp0, rt0, hh0 = reference_step(raw, eids[0], nearbys[0], rates[0], hidden0)
    assert jnp.allclose(pe1[0], lp0, atol=1e-4, rtol=1e-4)
    assert jnp.allclose(prr1[0], rt0, atol=1e-4, rtol=1e-4)
    assert jnp.allclose(h1, hh0, atol=1e-4, rtol=1e-4)

    print("KERNEL_OK")
</pallas_src>

<mosaic_0001>
module attributes {stable_mosaic.version = 11 : i64} {
  func.func @kernel(%arg0: i32, %arg1: memref<184x128xf32, #tpu.memory_space<vmem>>, %arg2: memref<8x128xf32, #tpu.memory_space<vmem>>, %arg3: memref<8x32xf32, #tpu.memory_space<vmem>>, %arg4: memref<8x128xf32, #tpu.memory_space<vmem>>, %arg5: memref<8x32xf32, #tpu.memory_space<vmem>>) attributes {dimension_semantics = [#tpu.dimension_semantics<arbitrary>], iteration_bounds = array<i64: 4>, scalar_prefetch = 0 : i64, scratch_operands = 1 : i64, tpu.core_type = #tpu.core_type<tc>, window_params = [{pipeline_mode = #tpu.pipeline_mode<synchronous>, transform_indices = @transform_0, window_bounds = array<i64: 184, 128>}, {transform_indices = @transform_1, window_bounds = array<i64: 8, 128>}, {pipeline_mode = #tpu.pipeline_mode<synchronous>, transform_indices = @transform_2, window_bounds = array<i64: 8, 32>}, {transform_indices = @transform_3, window_bounds = array<i64: 8, 128>}]} {
    %c0_i32 = arith.constant 0 : i32
    %0 = arith.cmpi eq, %arg0, %c0_i32 : i32
    %1 = arith.extui %0 : i1 to i32
    %c0_i32_0 = arith.constant 0 : i32
    %2 = arith.cmpi ne, %1, %c0_i32_0 : i32
    scf.if %2 {
      %c0_35 = arith.constant 0 : index
      %c0_36 = arith.constant 0 : index
      %106 = vector.load %arg3[%c0_35, %c0_36] : memref<8x32xf32, #tpu.memory_space<vmem>>, vector<8x32xf32>
      %c0_37 = arith.constant 0 : index
      %c0_38 = arith.constant 0 : index
      %107 = vector.load %arg5[%c0_37, %c0_38] : memref<8x32xf32, #tpu.memory_space<vmem>>, vector<8x32xf32>
      tpu.vector_store %arg5[%c0_37, %c0_38], %106 {strides = array<i32>} : memref<8x32xf32, #tpu.memory_space<vmem>>, vector<8x32xf32>,
    } else {
    }
    %c0 = arith.constant 0 : index
    %c0_1 = arith.constant 0 : index
    %3 = vector.load %arg2[%c0, %c0_1] : memref<8x128xf32, #tpu.memory_space<vmem>>, vector<8x128xf32>
    %4 = vector.extract_strided_slice %3 {offsets = [0, 0], sizes = [8, 1], strides = [1, 1]} : vector<8x128xf32> to vector<8x1xf32>
    %5 = arith.fptosi %4 : vector<8x1xf32> to vector<8x1xi32>
    %6 = vector.extract_strided_slice %3 {offsets = [0, 1], sizes = [8, 8], strides = [1, 1]} : vector<8x128xf32> to vector<8x8xf32>
    %7 = vector.extract_strided_slice %3 {offsets = [0, 1], sizes = [8, 16], strides = [1, 1]} : vector<8x128xf32> to vector<8x16xf32>
    %c0_2 = arith.constant 0 : index
    %c0_3 = arith.constant 0 : index
    %8 = vector.load %arg5[%c0_2, %c0_3] : memref<8x32xf32, #tpu.memory_space<vmem>>, vector<8x32xf32>
    %9 = tpu.iota {dimensions = array<i32: 1>} : vector<8x32xi32>
    %10 = vector.broadcast %5 : vector<8x1xi32> to vector<8x32xi32>
    %11 = arith.cmpi eq, %9, %10 : vector<8x32xi32>
    %12 = arith.extui %11 : vector<8x32xi1> to vector<8x32xi32>
    %13 = arith.sitofp %12 : vector<8x32xi32> to vector<8x32xf32>
    %c0_4 = arith.constant 0 : index
    %c0_5 = arith.constant 0 : index
    %14 = vector.load %arg1[%c0_4, %c0_5] : memref<184x128xf32, #tpu.memory_space<vmem>>, vector<32x96xf32>
    %c32 = arith.constant 32 : index
    %c0_6 = arith.constant 0 : index
    %15 = vector.load %arg1[%c32, %c0_6] : memref<184x128xf32, #tpu.memory_space<vmem>>, vector<16x96xf32>
    %c48 = arith.constant 48 : index
    %c0_7 = arith.constant 0 : index
    %16 = vector.load %arg1[%c48, %c0_7] : memref<184x128xf32, #tpu.memory_space<vmem>>, vector<32x96xf32>
    %c176 = arith.constant 176 : index
    %c0_8 = arith.constant 0 : index
    %17 = vector.load %arg1[%c176, %c0_8] : memref<184x128xf32, #tpu.memory_space<vmem>>, vector<1x96xf32>
    %c177 = arith.constant 177 : index
    %c0_9 = arith.constant 0 : index
    %18 = vector.load %arg1[%c177, %c0_9] : memref<184x128xf32, #tpu.memory_space<vmem>>, vector<1x96xf32>
    %cst = arith.constant dense<0.000000e+00> : vector<8x96xf32>
    %19 = tpu.matmul %13, %14, %cst {dimension_numbers = #tpu.dot_dimension_numbers<[1], [0], [0], [1], [0, 0, 1, 1], [], []>} : vector<8x32xf32>, vector<32x96xf32>, vector<8x96xf32> -> vector<8x96xf32>
    %cst_10 = arith.constant dense<0.000000e+00> : vector<8x96xf32>
    %20 = tpu.matmul %7, %15, %cst_10 {dimension_numbers = #tpu.dot_dimension_numbers<[1], [0], [0], [1], [0, 0, 1, 1], [], []>} : vector<8x16xf32>, vector<16x96xf32>, vector<8x96xf32> -> vector<8x96xf32>
    %21 = arith.addf %19, %20 : vector<8x96xf32>
    %22 = vector.broadcast %17 : vector<1x96xf32> to vector<8x96xf32>
    %23 = arith.addf %21, %22 : vector<8x96xf32>
    %cst_11 = arith.constant dense<0.000000e+00> : vector<8x96xf32>
    %24 = tpu.matmul %8, %16, %cst_11 {dimension_numbers = #tpu.dot_dimension_numbers<[1], [0], [0], [1], [0, 0, 1, 1], [], []>} : vector<8x32xf32>, vector<32x96xf32>, vector<8x96xf32> -> vector<8x96xf32>
    %25 = vector.broadcast %18 : vector<1x96xf32> to vector<8x96xf32>
    %26 = arith.addf %24, %25 : vector<8x96xf32>
    %27 = vector.extract_strided_slice %23 {offsets = [0, 0], sizes = [8, 32], strides = [1, 1]} : vector<8x96xf32> to vector<8x32xf32>
    %28 = vector.extract_strided_slice %26 {offsets = [0, 0], sizes = [8, 32], strides = [1, 1]} : vector<8x96xf32> to vector<8x32xf32>
    %29 = arith.addf %27, %28 : vector<8x32xf32>
    %30 = arith.negf %29 : vector<8x32xf32>
    %31 = math.exp %30 : vector<8x32xf32>
    %cst_12 = arith.constant 1.000000e+00 : f32
    %32 = vector.broadcast %cst_12 : f32 to vector<8x32xf32>
    %33 = arith.addf %32, %31 : vector<8x32xf32>
    %34 = arith.divf %32, %33 : vector<8x32xf32>
    %35 = vector.extract_strided_slice %23 {offsets = [0, 32], sizes = [8, 32], strides = [1, 1]} : vector<8x96xf32> to vector<8x32xf32>
    %36 = vector.extract_strided_slice %26 {offsets = [0, 32], sizes = [8, 32], strides = [1, 1]} : vector<8x96xf32> to vector<8x32xf32>
    %37 = arith.addf %35, %36 : vector<8x32xf32>
    %38 = arith.negf %37 : vector<8x32xf32>
    %39 = math.exp %38 : vector<8x32xf32>
    %cst_13 = arith.constant 1.000000e+00 : f32
    %40 = vector.broadcast %cst_13 : f32 to vector<8x32xf32>
    %41 = arith.addf %40, %39 : vector<8x32xf32>
    %42 = arith.divf %40, %41 : vector<8x32xf32>
    %43 = vector.extract_strided_slice %23 {offsets = [0, 64], sizes = [8, 32], strides = [1, 1]} : vector<8x96xf32> to vector<8x32xf32>
    %44 = vector.extract_strided_slice %26 {offsets = [0, 64], sizes = [8, 32], strides = [1, 1]} : vector<8x96xf32> to vector<8x32xf32>
    %45 = arith.mulf %34, %44 : vector<8x32xf32>
    %46 = arith.addf %43, %45 : vector<8x32xf32>
    %47 = math.tanh %46 : vector<8x32xf32>
    %cst_14 = arith.constant 1.000000e+00 : f32
    %48 = vector.broadcast %cst_14 : f32 to vector<8x32xf32>
    %49 = arith.subf %48, %42 : vector<8x32xf32>
    %50 = arith.mulf %49, %47 : vector<8x32xf32>
    %51 = arith.mulf %42, %8 : vector<8x32xf32>
    %52 = arith.addf %50, %51 : vector<8x32xf32>
    %c0_15 = arith.constant 0 : index
    %c0_16 = arith.constant 0 : index
    %53 = vector.load %arg5[%c0_15, %c0_16] : memref<8x32xf32, #tpu.memory_space<vmem>>, vector<8x32xf32>
    tpu.vector_store %arg5[%c0_15, %c0_16], %52 {strides = array<i32>} : memref<8x32xf32, #tpu.memory_space<vmem>>, vector<8x32xf32>,
    %c80 = arith.constant 80 : index
    %c0_17 = arith.constant 0 : index
    %54 = vector.load %arg1[%c80, %c0_17] : memref<184x128xf32, #tpu.memory_space<vmem>>, vector<32x40xf32>
    %c178 = arith.constant 178 : index
    %c0_18 = arith.constant 0 : index
    %55 = vector.load %arg1[%c178, %c0_18] : memref<184x128xf32, #tpu.memory_space<vmem>>, vector<1x40xf32>
    %cst_19 = arith.constant dense<0.000000e+00> : vector<8x40xf32>
    %56 = tpu.matmul %52, %54, %cst_19 {dimension_numbers = #tpu.dot_dimension_numbers<[1], [0], [0], [1], [0, 0, 1, 1], [], []>} : vector<8x32xf32>, vector<32x40xf32>, vector<8x40xf32> -> vector<8x40xf32>
    %57 = vector.broadcast %55 : vector<1x40xf32> to vector<8x40xf32>
    %58 = arith.addf %56, %57 : vector<8x40xf32>
    %59 = vector.extract_strided_slice %58 {offsets = [0, 0], sizes = [8, 8], strides = [1, 1]} : vector<8x40xf32> to vector<8x8xf32>
    %60 = vector.extract_strided_slice %58 {offsets = [0, 8], sizes = [8, 32], strides = [1, 1]} : vector<8x40xf32> to vector<8x32xf32>
    %cst_20 = arith.constant dense<0xFF800000> : vector<8xf32>
    %61 = vector.multi_reduction <maximumf>, %59, %cst_20 [1] : vector<8x8xf32> to vector<8xf32>
    %62 = vector.shape_cast %61 : vector<8xf32> to vector<8x1xf32>
    %63 = vector.broadcast %62 : vector<8x1xf32> to vector<8x8xf32>
    %64 = arith.subf %59, %63 : vector<8x8xf32>
    %65 = math.exp %64 : vector<8x8xf32>
    %cst_21 = arith.constant dense<0.000000e+00> : vector<8xf32>
    %66 = vector.multi_reduction <add>, %65, %cst_21 [1] : vector<8x8xf32> to vector<8xf32>
    %67 = vector.shape_cast %66 : vector<8xf32> to vector<8x1xf32>
    %68 = math.log %67 : vector<8x1xf32>
    %69 = vector.broadcast %68 : vector<8x1xf32> to vector<8x8xf32>
    %70 = arith.subf %64, %69 : vector<8x8xf32>
    %71 = tpu.iota {dimensions = array<i32: 1>} : vector<8x8xi32>
    %cst_22 = arith.constant 0.000000e+00 : f32
    %72 = vector.broadcast %cst_22 : f32 to vector<8x8xf32>
    %73 = arith.cmpf oge, %64, %72 : vector<8x8xf32>
    %c8_i32 = arith.constant 8 : i32
    %74 = vector.broadcast %c8_i32 : i32 to vector<8x8xi32>
    %75 = arith.select %73, %71, %74 : vector<8x8xi1>, vector<8x8xi32>
    %cst_23 = arith.constant dense<2147483647> : vector<8xi32>
    %76 = vector.multi_reduction <minsi>, %75, %cst_23 [1] : vector<8x8xi32> to vector<8xi32>
    %77 = vector.shape_cast %76 : vector<8xi32> to vector<8x1xi32>
    %78 = vector.broadcast %77 : vector<8x1xi32> to vector<8x8xi32>
    %79 = arith.cmpi eq, %71, %78 : vector<8x8xi32>
    %cst_24 = arith.constant 0.000000e+00 : f32
    %80 = vector.broadcast %cst_24 : f32 to vector<8x8xf32>
    %81 = arith.select %79, %6, %80 : vector<8x8xi1>, vector<8x8xf32>
    %cst_25 = arith.constant dense<0.000000e+00> : vector<8xf32>
    %82 = vector.multi_reduction <add>, %81, %cst_25 [1] : vector<8x8xf32> to vector<8xf32>
    %83 = vector.shape_cast %82 : vector<8xf32> to vector<8x1xf32>
    %84 = arith.fptosi %83 : vector<8x1xf32> to vector<8x1xi32>
    %85 = vector.broadcast %84 : vector<8x1xi32> to vector<8x32xi32>
    %86 = arith.cmpi eq, %9, %85 : vector<8x32xi32>
    %87 = arith.extui %86 : vector<8x32xi1> to vector<8x32xi32>
    %88 = arith.sitofp %87 : vector<8x32xi32> to vector<8x32xf32>
    %c112 = arith.constant 112 : index
    %c0_26 = arith.constant 0 : index
    %89 = vector.load %arg1[%c112, %c0_26] : memref<184x128xf32, #tpu.memory_space<vmem>>, vector<32x32xf32>
    %cst_27 = arith.constant dense<0.000000e+00> : vector<8x32xf32>
    %90 = tpu.matmul %88, %89, %cst_27 {dimension_numbers = #tpu.dot_dimension_numbers<[1], [0], [0], [1], [0, 0, 1, 1], [], []>} : vector<8x32xf32>, vector<32x32xf32>, vector<8x32xf32> -> vector<8x32xf32>
    %91 = arith.addf %90, %60 : vector<8x32xf32>
    %c144 = arith.constant 144 : index
    %c0_28 = arith.constant 0 : index
    %92 = vector.load %arg1[%c144, %c0_28] : memref<184x128xf32, #tpu.memory_space<vmem>>, vector<32x88xf32>
    %c179 = arith.constant 179 : index
    %c0_29 = arith.constant 0 : index
    %93 = vector.load %arg1[%c179, %c0_29] : memref<184x128xf32, #tpu.memory_space<vmem>>, vector<1x88xf32>
    %cst_30 = arith.constant 0.000000e+00 : f32
    %94 = vector.broadcast %cst_30 : f32 to vector<8x32xf32>
    %95 = arith.maximumf %91, %94 : vector<8x32xf32>
    %cst_31 = arith.constant dense<0.000000e+00> : vector<8x88xf32>
    %96 = tpu.matmul %95, %92, %cst_31 {dimension_numbers = #tpu.dot_dimension_numbers<[1], [0], [0], [1], [0, 0, 1, 1], [], []>} : vector<8x32xf32>, vector<32x88xf32>, vector<8x88xf32> -> vector<8x88xf32>
    %97 = vector.broadcast %93 : vector<1x88xf32> to vector<8x88xf32>
    %98 = arith.addf %96, %97 : vector<8x88xf32>
    %99 = arith.negf %98 : vector<8x88xf32>
    %100 = math.exp %99 : vector<8x88xf32>
    %cst_32 = arith.constant 1.000000e+00 : f32
    %101 = vector.broadcast %cst_32 : f32 to vector<8x88xf32>
    %102 = arith.addf %101, %100 : vector<8x88xf32>
    %103 = arith.divf %101, %102 : vector<8x88xf32>
    %104 = tpu.concatenate %52, %70, %103 in 1 : vector<8x32xf32>, vector<8x8xf32>, vector<8x88xf32> -> vector<8x128xf32>
    %c0_33 = arith.constant 0 : index
    %c0_34 = arith.constant 0 : index
    %105 = vector.load %arg4[%c0_33, %c0_34] : memref<8x128xf32, #tpu.memory_space<vmem>>, vector<8x128xf32>
    tpu.vector_store %arg4[%c0_33, %c0_34], %104 {strides = array<i32>} : memref<8x128xf32, #tpu.memory_space<vmem>>, vector<8x128xf32>,
    return
  }
  func.func @transform_0(%arg0: i32) -> (i32, i32) {
    %c0_i32 = arith.constant 0 : i32
    %c0_i32_0 = arith.constant 0 : i32
    %c0_i32_1 = arith.constant 0 : i32
    return %c0_i32, %c0_i32_0 : i32, i32
  }
  func.func @transform_1(%arg0: i32) -> (i32, i32) {
    %c0_i32 = arith.constant 0 : i32
    %c0_i32_0 = arith.constant 0 : i32
    return %arg0, %c0_i32 : i32, i32
  }
  func.func @transform_2(%arg0: i32) -> (i32, i32) {
    %c0_i32 = arith.constant 0 : i32
    %c0_i32_0 = arith.constant 0 : i32
    %c0_i32_1 = arith.constant 0 : i32
    return %c0_i32, %c0_i32_0 : i32, i32
  }
  func.func @transform_3(%arg0: i32) -> (i32, i32) {
    %c0_i32 = arith.constant 0 : i32
    %c0_i32_0 = arith.constant 0 : i32
    return %arg0, %c0_i32 : i32, i32
  }
}

</mosaic_0001>

<bundles_post_ra>
// kernel: forward.1
= control target key start
LH: loop header
LB: loop body
LE: loop exit
PB: predicated region body
PF: predicated region fallthrough
CT: control target
= control target key end

     0   :  { %s1040_s12 = smov 0   ;;  %s1194_s0 = inlined_call_operand.vmem [shape: f32[184,128], index: 0, kind: input, shape index: {}]   ;;  %s1195_s1 = inlined_call_operand.vmem [shape: f32[32,128], index: 1, kind: input, shape index: {}]   ;;  %s1196_s2 = inlined_call_operand.vmem [shape: f32[8,32], index: 2, kind: input, shape index: {}]   ;;  %s1197_s3 = inlined_call_operand.vmem [shape: f32[32,128], index: 3, kind: output, shape index: {}]  }
   0x1 LB: > { %s818_s13 = sadd.s32 4294967295, %s1008_s12   ;;  %p822_p0 = scmp.ge.s32.totalorder %s1008_s12, 1  ;;  %s1008_s12 = sphi %s1040_s12, %s13_s12  }
   0x2   : > { %p136_p1 = scmp.lt.s32.totalorder %s1008_s12, 5 }
   0x4   : > { %p137_p2 = pnand %p822_p0, %p136_p1 }
   0x5   : > { %p158_p3 = scmp.lt.s32.totalorder (!%p137_p2), %s818_s13, 3  ;;  %p825_p4 = scmp.ne.s32.totalorder (!%p137_p2), %s818_s13, 0 }
   0x6   : > { %140 = sbr.rel (%p137_p2) target bundleno = 2218 (0x8aa), region = 32 }
   0xd   : > { %s159_s14 = scalar_select %p158_p3, %s818_s13, 3 }
   0xe   : > { %169 = sbr.rel (%p825_p4) target bundleno = 21 (0x15), region = 36  ;;  %v170_v0 = vld [vmem:[%s1196_s2] sm:$0xff] (!%p825_p4)  ;;  %vm171_vm0 = vcmask (!%p825_p4), 261120  }
   0xf   : > { %s823_s15 = sshll.u32 %s159_s14, 3  ;;  %172 = vst.msk [vmem:[#allocation2] sm:$0xff] (!%p825_p4), %vm171_vm0, %v170_v0 }
  0x10   : > { %s161_s18 = scalar_lea.vmem %s1195_s1, %s823_s15  ;;  %s1054_s21 = scalar_lea.vmem %s1197_s3, %s823_s15 }
  0x15 PF: > { %v173_v1 = vld [vmem:[%s161_s18] sm:$0xff]  ;;  %v189_v3 = vld [vmem:[%s1194_s0 + $0x28] sm:$0xff]  ;;  %s1010_s28 = smov 127   ;;  %v1011_v5 = vmov 0.0|0.0   ;;  %v1012_v7 = vmov 0   ;;  %vm1013_vm1 = vmmov 0   ;;  %v176_v24 = vlaneseq }
  0x16   : > { %v188_v2 = vld [vmem:[%s1194_s0 + $0x20] sm:$0xff]  ;;  %197 = vrot.lane.b32.xlu0 %v173_v1, %s1010_s28  ;;  %v965_v4 = vtrunc.f32 %v173_v1  ;;  %932 = vmatprep.subr.bf16.mxu0 %v1011_v5  ;;  %v1014_v8 = vmov 0.0   ;;  %v185_v11 = vld [vmem:[%s1194_s0 + $0x8] sm:$0xff]  ;;  %v186_v12 = vld [vmem:[%s1194_s0 + $0x10] sm:$0xff]  ;;  %s1015_s10 = smov 32   ;;  %vm199_vm2 = vcmask 130048  }
  0x17   : > { %v933_v6 = vpack.c.bf16 %v189_v3, %v188_v2  ;;  %987 = vset.pattern.permute.xlu0 %v1012_v7  ;;  %874 = vmatprep.mubr.msk.f32.mxu0 %vm1013_vm1, %v1014_v8  ;;  %v184_v9 = vld [vmem:[%s1194_s0] sm:$0xff]  ;;  %v187_v13 = vld [vmem:[%s1194_s0 + $0x18] sm:$0xff]  ;;  %v190_v17 = vld [vmem:[%s1194_s0 + $0x30] sm:$0xff]  ;;  %vm272_vm3 = vcmask 261120   ;;  %v1109_v25 = vand.u32 127, %v176_v24  ;;  %s1016_s23 = smov 64  }
  0x18   : > { %v966_v10 = vcvt.f32.s32 %v965_v4  ;;  %935 = vmatprep.subr.bf16.mxu1 %v1011_v5  ;;  %v936_v14 = vpack.c.bf16 %v185_v11, %v184_v9  ;;  %885 = vmatprep.mubr.msk.f32.mxu1 %vm1013_vm1, %v1014_v8  ;;  %v939_v15 = vpack.c.bf16 %v187_v13, %v186_v12  ;;  %v175_v16 = vld [vmem:[#allocation2] sm:$0xff]  ;;  %v191_v18 = vld [vmem:[%s1194_s0 + $0x38] sm:$0xff]  ;;  %v193_v21 = vld [vmem:[%s1194_s0 + $0x48] sm:$0xff]  ;;  %s1017_s7 = smov 96   ;;  %vm543_vm5 = vcmask 64512   ;;  %s1018_s11 = smov 120  }
  0x19   : > { %934 = vmatpush3.bf16.msra.mxu0 %v933_v6  ;;  %v942_v19 = vpack.c.bf16 %v191_v18, %v190_v17  ;;  %v192_v20 = vld [vmem:[%s1194_s0 + $0x40] sm:$0xff]  ;;  %v830_v30 = vld [vmem:[%s1194_s0 + $0xb1] ss:$0 sm:$0xff]  ;;  %v829_v37 = vld [vmem:[%s1194_s0 + $0xb0] ss:$0 sm:$0xff]  ;;  %vm762_vm10 = vcmask 326656  }
  0x1a   : > { %941 = vmatprep.subr.bf16.mxu0 %v1011_v5  ;;  %179 = vperm.xlu0 %987, %v966_v10   ;;  %v945_v23 = vpack.c.bf16 %v193_v21, %v192_v20  ;;  %v462_v48 = vld [vmem:[%s1194_s0 + $0x50] sm:$0xff]  ;;  %v463_v49 = vld [vmem:[%s1194_s0 + $0x58] sm:$0xff]  ;;  %v464_v50 = vld [vmem:[%s1194_s0 + $0x60] sm:$0xff] }
  0x1b   : > { %937 = vmatpush3.bf16.msra.mxu1 %v936_v14  ;;  %v948_v51 = vpack.c.bf16 %v463_v49, %v462_v48  ;;  %v465_v52 = vld [vmem:[%s1194_s0 + $0x68] sm:$0xff]  ;;  %v833_v62 = vld [vmem:[%s1194_s0 + $0xb2] ss:$0 sm:$0xff]  ;;  %v837_v48 = vld [vmem:[%s1194_s0 + $0xb3] ss:$0 sm:$0xff] }
  0x1c   : > { %938 = vmatprep.subr.bf16.mxu1 %v1011_v5  ;;  %v951_v53 = vpack.c.bf16 %v465_v52, %v464_v50 }
  0x1e   : > { %452 = vrot.lane.b32.xlu0 %v175_v16, %s1015_s10 }
  0x1f   : > { %940 = vmatpush3.bf16.msra.mxu1 %v939_v15  ;;  %v583_v15 = vld [vmem:[%s1194_s0 + $0x70] sm:$0xff] }
  0x20   : > { %947 = vmatprep.subr.bf16.mxu1 %v1011_v5 }
  0x88   : > { %v1099_v22 = vpop.permute.xlu0 %197 }
  0x89   : > { %875 = vmatmul.mubr.msk.f32.vlgmr.msra.gmra.mrb[0].mxu0 %vm199_vm2, %v1099_v22 }
  0x8a   : > { %943 = vmatpush3.bf16.msra.mxu0 %v942_v19  ;;  %896 = vmatprep.mubr.msk.f32.mxu0 %vm1013_vm1, %v1014_v8 }
  0x8b   : > { %944 = vmatprep.subr.bf16.mxu0 %v1011_v5 }
  0x8e   : > { %946 = vmatpush3.bf16.msra.mxu0 %v945_v23 }
  0x8f   : > { %953 = vmatprep.subr.bf16.mxu0 %v1011_v5 }
  0x91   : > { %897 = vmatmul.mubr.msk.f32.vlgmr.msra.gmra.mrb[2].mxu0 %vm272_vm3, %v175_v16  ;;  %v584_v16 = vld [vmem:[%s1194_s0 + $0x78] sm:$0xff] }
  0x92   : > { %918 = vmatprep.mubr.msk.f32.mxu0 %vm1013_vm1, %v1014_v8  ;;  %v954_v17 = vpack.c.bf16 %v584_v16, %v583_v15 }
  0x94   : > { %955 = vmatpush3.bf16.msra.mxu0 %v954_v17 }
  0x95   : > { %956 = vmatprep.subr.bf16.mxu0 %v1011_v5 }
  0x99   : > { %v180_v26 = vpop.permute.xlu0 %179 }
  0x9a   : > { %vm181_vm4 = vcmp.eq.s32.totalorder %v1109_v25, %v180_v26 }
  0x9b   : > { %v826_v27 = vsel %vm181_vm4, 1.0, %v1014_v8 }
  0x9c   : > { %886 = vmatmul.mubr.msk.f32.vlgmr.msra.gmra.mrb[0].mxu1 %vm272_vm3, %v826_v27 }
  0x9d   : > { %907 = vmatprep.mubr.msk.f32.mxu1 %vm1013_vm1, %v1014_v8  ;;  %949 = vmatpush3.bf16.msra.mxu1 %v948_v51  ;;  %v453_v55 = vpop.permute.xlu0 %452 }
  0x9e   : > { %950 = vmatprep.subr.bf16.mxu1 %v1011_v5 }
  0xa1   : > { %952 = vmatpush3.bf16.msra.mxu1 %v951_v53 }
  0xa2   : > { %959 = vmatprep.subr.bf16.mxu1 %v1011_v5 }
 0x15c   : > { %v268_v28 = vpop.f32.mrb[0].mxu0 }
 0x15d   : > { %v876_v29 = vpop.f32.mrb[1].mxu0 }
 0x164   : > { %v424_v31 = vpop.f32.mrb[2].mxu0 }
 0x165   : > { %v425_v32 = vadd.f32 %v830_v30, %v424_v31  ;;  %v898_v33 = vpop.f32.mrb[3].mxu0  ;;  %v585_v30 = vld [vmem:[%s1194_s0 + $0x80] sm:$0xff]  ;;  %v586_v31 = vld [vmem:[%s1194_s0 + $0x88] sm:$0xff] }
 0x167   : > { %436 = vrot.lane.b32.xlu1 %v425_v32, %s1016_s23 }
 0x16f   : > { %v342_v34 = vpop.f32.mrb[0].mxu1 }
 0x170   : > { %v343_v35 = vadd.f32 %v342_v34, %v268_v28  ;;  %v887_v36 = vpop.f32.mrb[1].mxu1 }
 0x172   : > { %v350_v38 = vadd.f32 %v829_v37, %v343_v35  ;;  %v664_v37 = vld [vmem:[%s1194_s0 + $0x90] sm:$0xff] }
 0x174   : > { %v428_v39 = vadd.f32 %v425_v32, %v350_v38  ;;  %v957_v32 = vpack.c.bf16 %v586_v31, %v585_v30 }
 0x176   : > { %v832_v40 = vmul.f32 -1.442695, %v428_v39  ;;  %958 = vmatpush3.bf16.msra.mxu0 %v957_v32 }
 0x178   : > { %988 = vpow2.f32 %v832_v40 }
 0x182   : > { %v989_v41 = vpop.eup %988 }
 0x183   : > { %v432_v42 = vadd.f32 1.0, %v989_v41 }
 0x185   : > { %990 = vrcp.f32 %v432_v42  ;;  %v667_v42 = vld [vmem:[%s1194_s0 + $0xa8] sm:$0xff] }
 0x18f   : > { %v991_v43 = vpop.eup %990 }
 0x190   : > { %v446_v56 = vsub.f32 1.0, %v991_v43  ;;  %v455_v58 = vmul.f32 %v991_v43, %v453_v55 }
 0x1d9   : > { %v437_v44 = vpop.permute.xlu1 %436 }
 0x1da   : > { %v439_v45 = vmul.f32 %v991_v43, %v437_v44 }
 0x1dc   : > { %441 = vrot.lane.b32.xlu1 %v439_v45, %s1016_s23 }
 0x24e   : > { %v442_v46 = vpop.permute.xlu1 %441 }
 0x24f   : > { %v444_v47 = vadd.f32 %v442_v46, %v350_v38  ;;  %v665_v38 = vld [vmem:[%s1194_s0 + $0x98] sm:$0xff] }
 0x250   : > { %v960_v39 = vpack.c.bf16 %v665_v38, %v664_v37 }
 0x251   : > { %992 = vtanh.f32 %v444_v47 }
 0x25b   : > { %v993_v54 = vpop.eup %992 }
 0x25c   : > { %448 = vrot.lane.b32.xlu1 %v993_v54, %s1017_s7 }
 0x2ce   : > { %v449_v57 = vpop.permute.xlu1 %448 }
 0x2cf   : > { %v451_v59 = vmul.f32 %v449_v57, %v446_v56 }
 0x2d1   : > { %v456_v60 = vadd.f32 %v455_v58, %v451_v59 }
 0x2d3   : > { %458 = vrot.lane.b32.xlu1 %v456_v60, %s1017_s7 }
 0x345   : > { %v1136_v61 = vpop.permute.xlu1 %458 }
 0x346   : > { %461 = vst.msk [vmem:[#allocation2] sm:$0xff] %vm272_vm3, %v1136_v61  ;;  %908 = vmatmul.mubr.msk.f32.vlgmr.msra.gmra.mrb[2].mxu1 %vm272_vm3, %v1136_v61 }
 0x347   : > { %929 = vmatprep.mubr.msk.f32.mxu1 %vm1013_vm1, %v1014_v8  ;;  %961 = vmatpush3.bf16.msra.mxu1 %v960_v39 }
 0x348   : > { %962 = vmatprep.subr.bf16.mxu1 %v1011_v5 }
 0x419   : > { %v539_v63 = vpop.f32.mrb[2].mxu1 }
 0x41a   : > { %v540_v0 = vadd.f32 %v833_v62, %v539_v63  ;;  %v909_v1 = vpop.f32.mrb[3].mxu1 }
 0x41c   : > { %v544_v2 = vsel %vm543_vm5, %v540_v0, -inf }
 0x41d   : > { %545 = vmax.xlane.f32.xlu0 %v544_v2 }
 0x4aa   : > { %v546_v3 = vpop.xlane.xlu0 %545 }
 0x4ab   : > { %v547_v4 = vsub.f32 %v540_v0, %v546_v3 }
 0x4ad   : > { %vm556_vm6 = vcmp.ge.f32.partialorder %v547_v4, 0.0  ;;  %v548_v18 = vmul.f32 1.442695, %v547_v4 }
 0x4ae   : > { %v557_v6 = vsel %vm556_vm6, %v1109_v25, 8 }
 0x4af   : > { %v558_v7 = vsel %vm543_vm5, %v557_v6, 2147483647  ;;  %994 = vpow2.f32 %v548_v18 }
 0x4b0   : > { %v560_v9 = vshra.s32 %v558_v7, 16  ;;  %v559_v11 = vand.u32 65535, %v558_v7 }
 0x4b2   : > { %v562_v10 = vcvt.s32.f32 %v560_v9  ;;  %v561_v13 = vcvt.s32.f32 %v559_v11 }
 0x4b4   : > { %563 = vmin.xlane.f32.xlu1 %v562_v10 }
 0x4b9   : > { %v995_v28 = vpop.eup %994 }
 0x4ba   : > { %v550_v29 = vsel %vm543_vm5, %v995_v28, 0.0 }
 0x4c5   : > { %588 = vrot.lane.b32.xlu1 %v540_v0, %s1018_s11 }
 0x541   : > { %v564_v12 = vpop.xlane.xlu1 %563 }
 0x542   : > { %vm565_vm7 = vcmp.eq.f32.partialorder %v562_v10, %v564_v12  ;;  %v570_v19 = vcvt.f32.s32 %v564_v12 }
 0x543   : > { %v566_v14 = vsel %vm565_vm7, %v561_v13, inf }
 0x544   : > { %567 = vmin.xlane.f32.xlu0 %v566_v14  ;;  %v571_v21 = vshll.u32 %v570_v19, 16 }
 0x545   : > { %v589_v44 = vpop.permute.xlu1 %588 }
 0x5d1   : > { %v568_v20 = vpop.xlane.xlu0 %567 }
 0x5d2   : > { %v569_v23 = vcvt.f32.s32 %v568_v20 }
 0x5d4   : > { %v572_v24 = vadd.s32 %v571_v21, %v569_v23 }
 0x5d6   : > { %vm573_vm8 = vcmp.eq.s32.totalorder %v1109_v25, %v572_v24 }
 0x5d7   : > { %v575_v26 = vsel %vm573_vm8, %v1099_v22, 0.0 }
 0x5d8   : > { %v576_v27 = vsel %vm543_vm5, %v575_v26, 0.0 }
 0x5d9   : > { %577 = vadd.xlane.f32.xlu0 %v576_v27 }
 0x5dd   : > { %551 = vadd.xlane.f32.xlu0 %v550_v29 }
 0x666   : > { %v578_v33 = vpop.xlane.xlu0 %577 }
 0x667   : > { %v967_v34 = vtrunc.f32 %v578_v33 }
 0x669   : > { %v968_v22 = vcvt.f32.s32 %v967_v34 }
 0x66a   : > { %v552_v35 = vpop.xlane.xlu0 %551 }
 0x66b   : > { %vm580_vm9 = vcmp.eq.s32.totalorder %v1109_v25, %v968_v22  ;;  %996 = vlog2.f32 %v552_v35 }
 0x66c   : > { %v835_v36 = vsel %vm580_vm9, 1.0, %v1014_v8  ;;  %v666_v8 = vld [vmem:[%s1194_s0 + $0xa0] sm:$0xff] }
 0x66d   : > { %919 = vmatmul.mubr.msk.f32.vlgmr.msra.gmra.mrb[4].mxu0 %vm272_vm3, %v835_v36  ;;  %v963_v43 = vpack.c.bf16 %v667_v42, %v666_v8 }
 0x66f   : > { %964 = vmatpush3.bf16.msra.mxu1 %v963_v43 }
 0x675   : > { %v997_v40 = vpop.eup %996 }
 0x676   : > { %v554_v41 = vmul.f32 0.6931472, %v997_v40 }
 0x678   : > { %v555_v25 = vsub.f32 %v547_v4, %v554_v41 }
 0x67a   : > { %754 = vrot.lane.b32.xlu0 %v555_v25, %s1015_s10  ;;  %s1019_s10 = smov 40  }
 0x6ec   : > { %v755_v56 = vpop.permute.xlu0 %754 }
 0x6ed   : > { %v761_v57 = vsel %vm272_vm3, %v1136_v61, %v755_v56 }
 0x740   : > { %v660_v45 = vpop.f32.mrb[4].mxu0 }
 0x741   : > { %v661_v46 = vadd.f32 %v660_v45, %v589_v44  ;;  %v920_v47 = vpop.f32.mrb[5].mxu0 }
 0x743   : > { %v669_v5 = vmax.f32 %v661_v46, 0.0 }
 0x745   : > { %930 = vmatmul.mubr.msk.f32.vlgmr.msra.gmra.mrb[4].mxu1 %vm272_vm3, %v669_v5 }
 0x818   : > { %v743_v49 = vpop.f32.mrb[4].mxu1 }
 0x819   : > { %v744_v50 = vadd.f32 %v837_v48, %v743_v49  ;;  %v931_v51 = vpop.f32.mrb[5].mxu1 }
 0x81b   : > { %v839_v52 = vmul.f32 -1.442695, %v744_v50 }
 0x81d   : > { %998 = vpow2.f32 %v839_v52 }
 0x827   : > { %v999_v53 = vpop.eup %998 }
 0x828   : > { %v750_v54 = vadd.f32 1.0, %v999_v53 }
 0x82a   : > { %1000 = vrcp.f32 %v750_v54 }
 0x834   : > { %v1001_v55 = vpop.eup %1000 }
 0x835   : > { %758 = vrot.lane.b32.xlu1 %v1001_v55, %s1019_s10 }
 0x8a7   : > { %v759_v58 = vpop.permute.xlu1 %758 }
 0x8a8   : > { %v763_v59 = vsel %vm762_vm10, %v761_v57, %v759_v58 }
 0x8a9   : > { %764 = vst [vmem:[%s1054_s21] sm:$0xff] %v763_v59 }
 0x8aa PF: > { %s13_s12 = sadd.s32 1, %s1008_s12  }
 0x8ab   : > { %p10_p5 = scmp.ge.s32.totalorder %s13_s12, 6  }
 0x8ad   :  { %12 = sbr.rel (!%p10_p5) target bundleno = 1 (0x1), region = 66 }

</bundles_post_ra>
